<compile_context>
chip_gen: v7x
topology: tpu7x:2x2x1
jax: 0.10.0
libtpu: 0.0.40
codegen_flags: <defaults>
</compile_context>

<pallas_src>
import functools

import jax
import jax.numpy as jnp
from jax.experimental import pallas as pl
from jax.experimental.pallas import tpu as pltpu


# ----------------------------- helpers ------------------------------------ #
def _round_up(n, m):
    return ((n + m - 1) // m) * m


def _pad2d(a, rows, cols):
    r, c = a.shape
    if r == rows and c == cols:
        return a
    return jnp.pad(a, ((0, rows - r), (0, cols - c)))


def _pick_tile(dim_pad, cap):
    """Largest multiple of 128 <= cap that divides dim_pad (dim_pad % 128 == 0)."""
    t = min(cap, dim_pad)
    while dim_pad % t != 0:
        t -= 128
    return t


# ----------------------------- Pallas kernel ------------------------------ #
def _fused_matmul_kernel(*refs, has_proj, has_res, apply_relu, single_k):
    it = iter(refs)
    x_ref = next(it)                          # (tm, tk)  bf16
    w_ref = next(it)                          # (tk, tn)  bf16  (BN scale folded)
    b_ref = next(it)                          # (1,  tn)  f32   (BN bias, combined)
    xs_ref = next(it) if has_proj else None   # (tm, Ks)  bf16
    wsc_ref = next(it) if has_proj else None  # (Ks, tn)  bf16
    res_ref = next(it) if has_res else None   # (tm, tn)  f32
    o_ref = next(it)                          # (tm, tn)  out dtype
    acc_ref = None if single_k else next(it)  # (tm, tn)  f32 VMEM scratch

    def epilogue(acc):
        acc = acc + b_ref[...]
        if has_proj:   # fused 1x1 projection shortcut (single extra MXU pass)
            acc = acc + jnp.dot(xs_ref[...], wsc_ref[...],
                                preferred_element_type=jnp.float32)
        if has_res:    # identity residual
            acc = acc + res_ref[...]
        if apply_relu:
            acc = jnp.maximum(acc, 0.0)
        return acc.astype(o_ref.dtype)

    if single_k:
        # K fits one tile: no scratch accumulator, no init/finalize gating.
        acc = jnp.dot(x_ref[...], w_ref[...], preferred_element_type=jnp.float32)
        o_ref[...] = epilogue(acc)
    else:
        k = pl.program_id(2)

        @pl.when(k == 0)
        def _init():
            acc_ref[...] = jnp.zeros_like(acc_ref)

        acc_ref[...] += jnp.dot(x_ref[...], w_ref[...],
                                preferred_element_type=jnp.float32)

        @pl.when(k == pl.num_programs(2) - 1)
        def _finalize():
            o_ref[...] = epilogue(acc_ref[...])


def fused_matmul_bn(x, w, bias, *, proj=None, res=None, apply_relu,
                    out_dtype=jnp.float32):
    """relu?( x[M,K] @ w[K,C] + bias[1,C] (+ xs @ wsc) (+ res[M,C]) ).

    All shapes must already be zero-padded to multiples of 128.
    """
    M, K = x.shape
    C = w.shape[1]
    tm = _pick_tile(M, 512)
    tk = _pick_tile(K, 512)
    tn = _pick_tile(C, 512)
    gk = K // tk
    single_k = gk == 1

    if single_k:
        grid = (M // tm, C // tn)
        x_map = lambda i, j: (i, 0)
        w_map = lambda i, j: (0, j)
        b_map = lambda i, j: (0, j)
        o_map = lambda i, j: (i, j)
        xs_map = lambda i, j: (i, 0)
        ws_map = lambda i, j: (0, j)
        r_map = lambda i, j: (i, j)
        dims = ("parallel", "parallel")
        scratch = []
    else:
        grid = (M // tm, C // tn, gk)          # reduction axis last
        x_map = lambda i, j, k: (i, k)
        w_map = lambda i, j, k: (k, j)
        b_map = lambda i, j, k: (0, j)
        o_map = lambda i, j, k: (i, j)
        xs_map = lambda i, j, k: (i, 0)
        ws_map = lambda i, j, k: (0, j)
        r_map = lambda i, j, k: (i, j)
        dims = ("parallel", "parallel", "arbitrary")
        scratch = [pltpu.VMEM((tm, tn), jnp.float32)]

    in_specs = [
        pl.BlockSpec((tm, tk), x_map),
        pl.BlockSpec((tk, tn), w_map),
        pl.BlockSpec((1, tn), b_map),
    ]
    args = [x, w, bias]
    flops = 2 * M * K * C
    bytes_accessed = (x.size * x.dtype.itemsize + w.size * w.dtype.itemsize
                      + bias.size * bias.dtype.itemsize
                      + M * C * jnp.dtype(out_dtype).itemsize)

    if proj is not None:
        xs, wsc = proj
        ks_pad = xs.shape[1]
        in_specs += [
            pl.BlockSpec((tm, ks_pad), xs_map),
            pl.BlockSpec((ks_pad, tn), ws_map),
        ]
        args += [xs, wsc]
        flops += 2 * M * ks_pad * C
        bytes_accessed += (xs.size * xs.dtype.itemsize
                           + wsc.size * wsc.dtype.itemsize)

    if res is not None:
        in_specs.append(pl.BlockSpec((tm, tn), r_map))
        args.append(res)
        bytes_accessed += res.size * res.dtype.itemsize

    kern = functools.partial(_fused_matmul_kernel,
                             has_proj=proj is not None,
                             has_res=res is not None,
                             apply_relu=apply_relu,
                             single_k=single_k)

    return pl.pallas_call(
        kern,
        out_shape=jax.ShapeDtypeStruct((M, C), out_dtype),
        grid_spec=pltpu.PrefetchScalarGridSpec(
            num_scalar_prefetch=0,
            grid=grid,
            in_specs=in_specs,
            out_specs=pl.BlockSpec((tm, tn), o_map),
            scratch_shapes=scratch,
        ),
        compiler_params=pltpu.CompilerParams(
            dimension_semantics=dims,
            vmem_limit_bytes=48 * 1024 * 1024,   # fits v7x's 64 MiB with headroom
        ),
        cost_estimate=pl.CostEstimate(flops=flops, transcendentals=0,
                                      bytes_accessed=bytes_accessed),
    )(*args)


# ------------------------------ JAX glue ---------------------------------- #
def im2col(x_nhwc, ksize, stride, pad):
    N, H, W, C = x_nhwc.shape
    xp = jnp.pad(x_nhwc, ((0, 0), (pad, pad), (pad, pad), (0, 0)))
    Ho = (H + 2 * pad - ksize) // stride + 1
    Wo = (W + 2 * pad - ksize) // stride + 1
    cols = []
    for kh in range(ksize):
        for kw in range(ksize):
            patch = xp[:, kh:kh + Ho * stride:stride,
                          kw:kw + Wo * stride:stride, :]
            cols.append(patch)
    patches = jnp.concatenate(cols, axis=-1)          # [N, Ho, Wo, k*k*C]
    return patches.reshape(N * Ho * Wo, ksize * ksize * C), (N, Ho, Wo)


def fold_bn(gamma, beta, mean, var, eps=1e-5):
    scale = gamma / jnp.sqrt(var + eps)
    bias = beta - mean * scale
    return scale.astype(jnp.float32), bias.astype(jnp.float32)


def basic_block_forward(x_nchw, p, stride):
    """Pallas-backed BasicBlock forward. Input/Output: NCHW float32."""
    x = jnp.transpose(x_nchw, (0, 2, 3, 1))           # -> NHWC
    N, H, W, Cin = x.shape
    Cout = p["w1"].shape[-1]
    C_pad = _round_up(Cout, 128)

    xb = x.astype(jnp.bfloat16)                       # bf16 activations

    # ---- conv1 (3x3, stride, pad 1) + BN1 + ReLU --------------------------
    p1, (N, Ho, Wo) = im2col(xb, 3, stride, 1)
    M = N * Ho * Wo
    M_pad = _round_up(M, 128)
    K1 = 9 * Cin
    K1_pad = _round_up(K1, 128)
    w1 = (p["w1"].reshape(K1, Cout) * p["s1"][None, :]).astype(jnp.bfloat16)
    y1 = fused_matmul_bn(
        _pad2d(p1, M_pad, K1_pad),
        _pad2d(w1, K1_pad, C_pad),
        _pad2d(p["b1"].reshape(1, Cout), 1, C_pad),
        apply_relu=True, out_dtype=jnp.bfloat16)      # intermediate stays bf16
    y1_nhwc = y1[:M, :Cout].reshape(N, Ho, Wo, Cout)

    # ---- shortcut ----------------------------------------------------------
    if stride != 1 or Cin != Cout:
        # 1x1 stride-s projection + BNsc, fused into the conv2 kernel.
        Ksc_pad = _round_up(Cin, 128)
        xs = xb[:, ::stride, ::stride, :].reshape(M, Cin)
        wsc = (p["wsc"].reshape(Cin, Cout) * p["ssc"][None, :]).astype(jnp.bfloat16)
        proj = (_pad2d(xs, M_pad, Ksc_pad), _pad2d(wsc, Ksc_pad, C_pad))
        res = None
        bias2 = p["b2"] + p["bsc"]
    else:
        proj = None
        res = _pad2d(x.reshape(M, Cin), M_pad, C_pad)   # identity, f32
        bias2 = p["b2"]

    # ---- conv2 (3x3, stride 1) + BN2 + shortcut + ReLU --------------------
    p2, _ = im2col(y1_nhwc, 3, 1, 1)                  # already bf16
    K2 = 9 * Cout
    K2_pad = _round_up(K2, 128)
    w2 = (p["w2"].reshape(K2, Cout) * p["s2"][None, :]).astype(jnp.bfloat16)
    y2 = fused_matmul_bn(
        _pad2d(p2, M_pad, K2_pad),
        _pad2d(w2, K2_pad, C_pad),
        _pad2d(bias2.reshape(1, Cout), 1, C_pad),
        proj=proj, res=res, apply_relu=True, out_dtype=jnp.float32)

    out = y2[:M, :Cout].reshape(N, Ho, Wo, Cout)
    return jnp.transpose(out, (0, 3, 1, 2))           # -> NCHW


# ------------------------------ Reference ---------------------------------- #
def ref_forward(x, p, stride):
    dn = ("NCHW", "HWIO", "NCHW")
    hi = jax.lax.Precision.HIGHEST

    def bn(y, s, b):
        return y * s[None, :, None, None] + b[None, :, None, None]

    y = jax.lax.conv_general_dilated(x, p["w1"], (stride, stride),
                                     ((1, 1), (1, 1)), dimension_numbers=dn,
                                     precision=hi)
    y = jnp.maximum(bn(y, p["s1"], p["b1"]), 0.0)
    y2 = jax.lax.conv_general_dilated(y, p["w2"], (1, 1),
                                      ((1, 1), (1, 1)), dimension_numbers=dn,
                                      precision=hi)
    y2 = bn(y2, p["s2"], p["b2"])
    Cin, Cout = x.shape[1], p["w1"].shape[-1]
    if stride != 1 or Cin != Cout:
        sc = jax.lax.conv_general_dilated(x, p["wsc"], (stride, stride),
                                          ((0, 0), (0, 0)),
                                          dimension_numbers=dn, precision=hi)
        sc = bn(sc, p["ssc"], p["bsc"])
    else:
        sc = x
    return jnp.maximum(y2 + sc, 0.0)


# --------------------------------- Main ------------------------------------ #
if __name__ == "__main__":
    key = jax.random.PRNGKey(0)

    def bn_params(k, C):
        k1, k2, k3, k4 = jax.random.split(k, 4)
        gamma = 1.0 + 0.1 * jax.random.normal(k1, (C,), jnp.float32)
        beta = 0.1 * jax.random.normal(k2, (C,), jnp.float32)
        mean = 0.1 * jax.random.normal(k3, (C,), jnp.float32)
        var = 1.0 + 0.1 * jax.random.uniform(k4, (C,), jnp.float32)
        return fold_bn(gamma, beta, mean, var)

    def make_params(k, Cin, Cout, with_proj):
        ks = jax.random.split(k, 6)
        p = dict(
            w1=0.1 * jax.random.normal(ks[0], (3, 3, Cin, Cout), jnp.float32),
            w2=0.1 * jax.random.normal(ks[1], (3, 3, Cout, Cout), jnp.float32),
        )
        p["s1"], p["b1"] = bn_params(ks[2], Cout)
        p["s2"], p["b2"] = bn_params(ks[3], Cout)
        if with_proj:
            p["wsc"] = 0.1 * jax.random.normal(ks[4], (1, 1, Cin, Cout),
                                               jnp.float32)
            p["ssc"], p["bsc"] = bn_params(ks[5], Cout)
        return p

    k1, k2, k3, k4 = jax.random.split(key, 4)

    # Case 1: projection shortcut (stride 2, Cin != Cout)
    x1 = jax.random.normal(k1, (2, 4, 16, 16), jnp.float32)
    p1 = make_params(k2, 4, 8, with_proj=True)
    out1 = jax.block_until_ready(basic_block_forward(x1, p1, stride=2))
    ref1 = jax.block_until_ready(ref_forward(x1, p1, stride=2))
    assert out1.shape == (2, 8, 8, 8), out1.shape
    if not jnp.allclose(out1, ref1, atol=5e-2, rtol=5e-2):
        raise AssertionError("Pallas BasicBlock (projection) mismatch vs reference")

    # Case 2: identity shortcut (stride 1, Cin == Cout)
    x2 = jax.random.normal(k3, (2, 8, 8, 8), jnp.float32)
    p2 = make_params(k4, 8, 8, with_proj=False)
    out2 = jax.block_until_ready(basic_block_forward(x2, p2, stride=1))
    ref2 = jax.block_until_ready(ref_forward(x2, p2, stride=1))
    assert out2.shape == (2, 8, 8, 8), out2.shape
    if not jnp.allclose(out2, ref2, atol=5e-2, rtol=5e-2):
        raise AssertionError("Pallas BasicBlock (identity) mismatch vs reference")

    print("KERNEL_OK")
</pallas_src>

<mosaic_0001>
module attributes {stable_mosaic.version = 11 : i64} {
  func.func @_fused_matmul_kernel(%arg0: i32, %arg1: i32, %arg2: memref<128x128xbf16, #tpu.memory_space<vmem>>, %arg3: memref<128x128xbf16, #tpu.memory_space<vmem>>, %arg4: memref<1x128xf32, #tpu.memory_space<vmem>>, %arg5: memref<128x128xbf16, #tpu.memory_space<vmem>>) attributes {dimension_semantics = [#tpu.dimension_semantics<parallel>, #tpu.dimension_semantics<parallel>], iteration_bounds = array<i64: 1, 1>, scalar_prefetch = 0 : i64, scratch_operands = 0 : i64, tpu.core_type = #tpu.core_type<tc>, window_params = [{transform_indices = @transform_0, window_bounds = array<i64: 128, 128>}, {transform_indices = @transform_1, window_bounds = array<i64: 128, 128>}, {transform_indices = @transform_2, window_bounds = array<i64: 1, 128>}, {transform_indices = @transform_3, window_bounds = array<i64: 128, 128>}]} {
    %c0 = arith.constant 0 : index
    %c0_0 = arith.constant 0 : index
    %0 = vector.load %arg2[%c0, %c0_0] : memref<128x128xbf16, #tpu.memory_space<vmem>>, vector<128x128xbf16>
    %c0_1 = arith.constant 0 : index
    %c0_2 = arith.constant 0 : index
    %1 = vector.load %arg3[%c0_1, %c0_2] : memref<128x128xbf16, #tpu.memory_space<vmem>>, vector<128x128xbf16>
    %cst = arith.constant dense<0.000000e+00> : vector<128x128xf32>
    %2 = tpu.matmul %0, %1, %cst {dimension_numbers = #tpu.dot_dimension_numbers<[1], [0], [0], [1], [0, 0, 1, 1], [], []>} : vector<128x128xbf16>, vector<128x128xbf16>, vector<128x128xf32> -> vector<128x128xf32>
    %c0_3 = arith.constant 0 : index
    %c0_4 = arith.constant 0 : index
    %3 = vector.load %arg4[%c0_3, %c0_4] : memref<1x128xf32, #tpu.memory_space<vmem>>, vector<1x128xf32>
    %4 = vector.broadcast %3 : vector<1x128xf32> to vector<128x128xf32>
    %5 = arith.addf %2, %4 : vector<128x128xf32>
    %cst_5 = arith.constant 0.000000e+00 : f32
    %6 = vector.broadcast %cst_5 : f32 to vector<128x128xf32>
    %7 = arith.maximumf %5, %6 : vector<128x128xf32>
    %8 = arith.truncf %7 : vector<128x128xf32> to vector<128x128xbf16>
    %c0_6 = arith.constant 0 : index
    %c0_7 = arith.constant 0 : index
    %9 = vector.load %arg5[%c0_6, %c0_7] : memref<128x128xbf16, #tpu.memory_space<vmem>>, vector<128x128xbf16>
    tpu.vector_store %arg5[%c0_6, %c0_7], %8 {strides = array<i32>} : memref<128x128xbf16, #tpu.memory_space<vmem>>, vector<128x128xbf16>,
    return
  }
  func.func @transform_0(%arg0: i32, %arg1: i32) -> (i32, i32) {
    %c0_i32 = arith.constant 0 : i32
    %c0_i32_0 = arith.constant 0 : i32
    return %arg0, %c0_i32 : i32, i32
  }
  func.func @transform_1(%arg0: i32, %arg1: i32) -> (i32, i32) {
    %c0_i32 = arith.constant 0 : i32
    %c0_i32_0 = arith.constant 0 : i32
    return %c0_i32, %arg1 : i32, i32
  }
  func.func @transform_2(%arg0: i32, %arg1: i32) -> (i32, i32) {
    %c0_i32 = arith.constant 0 : i32
    %c0_i32_0 = arith.constant 0 : i32
    return %c0_i32, %arg1 : i32, i32
  }
  func.func @transform_3(%arg0: i32, %arg1: i32) -> (i32, i32) {
    %c0_i32 = arith.constant 0 : i32
    return %arg0, %arg1 : i32, i32
  }
}

</mosaic_0001>

<bundles_post_ra>
// kernel: tpu_custom_call.1
= control target key start
LH: loop header
LB: loop body
LE: loop exit
PB: predicated region body
PF: predicated region fallthrough
CT: control target
= control target key end

     0   :  { %8 = vsyncpa [#allocation3], 0  ;;  %s716_s0 = inlined_call_operand.hbm [shape: bf16[128,128], index: 0, kind: input, shape index: {}]   ;;  %s717_s1 = inlined_call_operand.hbm [shape: bf16[128,128], index: 1, kind: input, shape index: {}]   ;;  %s718_s2 = inlined_call_operand.vmem [shape: f32[1,128], index: 2, kind: input, shape index: {}]   ;;  %s719_s3 = inlined_call_operand.hbm [shape: bf16[128,128], index: 3, kind: output, shape index: {}]  }
   0x1   :  { %9 = vsyncpa [#allocation6], 0 }
   0x2   :  { %10 = vsyncpa [#allocation4], 0  ;;  %s643_s12 = smov [#allocation2]   ;;  %s571_s16 = scalar_lea.hbm %s716_s0, 1024 }
   0x3   :  { %s16_s13 = sshll.u32 %s643_s12, 4  ;;  %p572_p0 = scmp.ne.s32.totalorder %s716_s0, %s571_s16  ;;  %s17_s13 = int_to_ptr.vmem [resolvable:$true] %s16_s13 }
   0x4   :  { %p575_p1 = scmp.lt.u32.totalorder %s571_s16, %s716_s0 }
   0x6   :  { %p577_p2 = pnand %p575_p1, %p572_p0 }
   0x8   :  { %580 = shalt.err (!%p577_p2)
}
   0x9   :  { %s581_s21 = scalar_lea.vmem %s17_s13, 1024  ;;  %p586_p4 = scmp.lt.s32.totalorder %s17_s13, %s17_s13 }
   0xa   :  { %p582_p3 = scmp.ne.s32.totalorder %s17_s13, %s581_s21  ;;  %p587_p5 = scmp.lt.s32.totalorder %s581_s21, %s581_s21 }
   0xc   :  { %p588_p6 = por %p587_p5, %p586_p4 }
   0xe   :  { %p589_p7 = pnand %p588_p6, %p582_p3 }
  0x10   :  { %592 = shalt.err (!%p589_p7)
}
  0x11   :  { %s644_s22 = smov 64   ;;  %s645_s23 = smov 4  }
  0x12   :  { %22 = dma.hbm_to_vmem [thread:$0]  %s716_s0, 1024, %s17_s13, [#allocation3], %s644_s22, %s644_s22, %s645_s23  }
  0x13   :  { %s646_s26 = smov [#allocation5]   ;;  %s593_s30 = scalar_lea.hbm %s717_s1, 1024 }
  0x14   :  { %s28_s27 = sshll.u32 %s646_s26, 4  ;;  %p594_p8 = scmp.ne.s32.totalorder %s717_s1, %s593_s30  ;;  %s29_s27 = int_to_ptr.vmem [resolvable:$true] %s28_s27 }
  0x15   :  { %p597_p9 = scmp.lt.u32.totalorder %s593_s30, %s717_s1 }
  0x17   :  { %p599_p10 = pnand %p597_p9, %p594_p8 }
  0x19   :  { %602 = shalt.err (!%p599_p10)
}
  0x1a   :  { %s603_s8 = scalar_lea.vmem %s29_s27, 1024  ;;  %p608_p12 = scmp.lt.s32.totalorder %s29_s27, %s29_s27 }
  0x1b   :  { %p604_p11 = scmp.ne.s32.totalorder %s29_s27, %s603_s8  ;;  %p609_p13 = scmp.lt.s32.totalorder %s603_s8, %s603_s8 }
  0x1d   :  { %p610_p0 = por %p609_p13, %p608_p12 }
  0x1f   :  { %p611_p1 = pnand %p610_p0, %p604_p11 }
  0x21   :  { %614 = shalt.err (!%p611_p1)
}
  0x22   :  { %34 = dma.hbm_to_vmem [thread:$0]  %s717_s1, 1024, %s29_s27, [#allocation6], %s644_s22, %s644_s22, %s645_s23  }
  0x23   :  { %637 = dma.done.wait [#allocation3], 1024  }
  0x24   :  { %638 = vsyncadd [#allocation3], 4294966272 }
  0x25   :  { %639 = dma.done.wait [#allocation6], 1024  }
  0x26   :  { %640 = vsyncadd [#allocation6], 4294966272  ;;  %v555_v0 = vld [vmem:[#allocation5] sm:$0xff]   ;;  %v556_v1 = vld [vmem:[#allocation5 + $0x8] sm:$0xff]  }
  0x27   :  { %502 = vmatprep.subr.bf16.mxu0 %v555_v0  ;;  %534 = vmatprep.subr.bf16.mxu1 %v555_v0  ;;  %v557_v2 = vld [vmem:[#allocation5 + $0x10] sm:$0xff]   ;;  %v558_v3 = vld [vmem:[#allocation5 + $0x18] sm:$0xff]   ;;  %v563_v4 = vld [vmem:[#allocation2] sm:$0xff]  }
  0x28   :  { %503 = vmatpush3.bf16.msra.mxu0 %v555_v0  ;;  %542 = vmatpush3.bf16.msra.mxu1 %v555_v0  ;;  %v564_v5 = vld [vmem:[#allocation2 + $0x20] sm:$0xff]   ;;  %v560_v7 = vld [vmem:[#allocation5 + $0x28] sm:$0xff]   ;;  %v561_v8 = vld [vmem:[#allocation5 + $0x30] sm:$0xff]  }
  0x29   :  { %504 = vmatprep.subr.bf16.mxu0 %v556_v1  ;;  %535 = vmatprep.subr.bf16.mxu1 %v556_v1  ;;  %v559_v6 = vld [vmem:[#allocation5 + $0x20] sm:$0xff]   ;;  %v562_v9 = vld [vmem:[#allocation5 + $0x38] sm:$0xff]   ;;  %v565_v10 = vld [vmem:[#allocation2 + $0x8] sm:$0xff]  }
  0x2a   :  { %518 = vmatprep.mubr.bf16.mxu0 %v563_v4  ;;  %526 = vmatprep.mubr.bf16.mxu1 %v564_v5  ;;  %v566_v11 = vld [vmem:[#allocation2 + $0x28] sm:$0xff]   ;;  %v567_v12 = vld [vmem:[#allocation2 + $0x10] sm:$0xff]   ;;  %v569_v14 = vld [vmem:[#allocation2 + $0x18] sm:$0xff]  }
  0x2b   :  { %v568_v13 = vld [vmem:[#allocation2 + $0x30] sm:$0xff]   ;;  %v570_v15 = vld [vmem:[#allocation2 + $0x38] sm:$0xff]   ;;  %v390_v16 = vld [vmem:[%s718_s2] ss:$0 sm:$0xff]  ;;  %s647_s2 = smov [#allocation7]  }
  0x2c   :  { %505 = vmatpush3.bf16.msra.mxu0 %v556_v1  ;;  %543 = vmatpush3.bf16.msra.mxu1 %v556_v1  ;;  %s377_s11 = sshll.u32 %s647_s2, 4  ;;  %s378_s11 = int_to_ptr.vmem [resolvable:$true] %s377_s11 }
  0x2d   :  { %506 = vmatprep.subr.bf16.mxu0 %v557_v2  ;;  %536 = vmatprep.subr.bf16.mxu1 %v557_v2  ;;  %s615_s12 = scalar_lea.vmem %s378_s11, 1024  ;;  %p620_p3 = scmp.lt.s32.totalorder %s378_s11, %s378_s11 }
  0x2e   :  { %p616_p2 = scmp.ne.s32.totalorder %s378_s11, %s615_s12  ;;  %p621_p4 = scmp.lt.s32.totalorder %s615_s12, %s615_s12 }
  0x30   :  { %507 = vmatpush3.bf16.msra.mxu0 %v557_v2  ;;  %544 = vmatpush3.bf16.msra.mxu1 %v557_v2  ;;  %p622_p5 = por %p621_p4, %p620_p3 }
  0x31   :  { %508 = vmatprep.subr.bf16.mxu0 %v558_v3  ;;  %537 = vmatprep.subr.bf16.mxu1 %v558_v3 }
  0x32   :  { %p623_p6 = pnand %p622_p5, %p616_p2 }
  0x34   :  { %509 = vmatpush3.bf16.msra.mxu0 %v558_v3  ;;  %545 = vmatpush3.bf16.msra.mxu1 %v558_v3 }
  0x35   :  { %510 = vmatprep.subr.bf16.mxu0 %v559_v6  ;;  %538 = vmatprep.subr.bf16.mxu1 %v559_v6 }
  0x38   :  { %511 = vmatpush3.bf16.msra.mxu0 %v559_v6  ;;  %546 = vmatpush3.bf16.msra.mxu1 %v559_v6 }
  0x39   :  { %512 = vmatprep.subr.bf16.mxu0 %v560_v7  ;;  %539 = vmatprep.subr.bf16.mxu1 %v560_v7 }
  0x3c   :  { %513 = vmatpush3.bf16.msra.mxu0 %v560_v7  ;;  %547 = vmatpush3.bf16.msra.mxu1 %v560_v7 }
  0x3d   :  { %514 = vmatprep.subr.bf16.mxu0 %v561_v8  ;;  %540 = vmatprep.subr.bf16.mxu1 %v561_v8 }
  0x40   :  { %515 = vmatpush3.bf16.msra.mxu0 %v561_v8  ;;  %548 = vmatpush3.bf16.msra.mxu1 %v561_v8 }
  0x41   :  { %516 = vmatprep.subr.bf16.mxu0 %v562_v9  ;;  %541 = vmatprep.subr.bf16.mxu1 %v562_v9 }
  0x44   :  { %517 = vmatpush3.bf16.msra.mxu0 %v562_v9  ;;  %549 = vmatpush3.bf16.msra.mxu1 %v562_v9 }
  0x47   :  { %519 = vmatmul.mubr.bf16.vlgmr.msra.gmra.mrb[0].mxu0 %v565_v10  ;;  %527 = vmatmul.mubr.bf16.vlgmr.msra.gmra.mrb[0].mxu1 %v566_v11 }
  0x48   :  { %522 = vmatprep.mubr.bf16.mxu0 %v567_v12  ;;  %530 = vmatprep.mubr.bf16.mxu1 %v568_v13 }
  0x4f   :  { %523 = vmatmul.mubr.bf16.gmra.mrb[4].mxu0 %v569_v14  ;;  %531 = vmatmul.mubr.bf16.gmra.mrb[4].mxu1 %v570_v15 }
 0x11a   :  { %v520_v17 = vpop.f32.mrb[0].mxu0  ;;  %v528_v18 = vpop.f32.mrb[0].mxu1 }
 0x11b   :  { %v222_v19 = vadd.f32 %v520_v17, %v390_v16  ;;  %v254_v20 = vadd.f32 %v528_v18, %v390_v16  ;;  %v213_v21 = vpop.f32.mrb[1].mxu0  ;;  %v245_v22 = vpop.f32.mrb[1].mxu1 }
 0x11c   :  { %v214_v23 = vadd.f32 %v390_v16, %v213_v21  ;;  %v246_v24 = vadd.f32 %v390_v16, %v245_v22  ;;  %v521_v25 = vpop.f32.mrb[2].mxu0  ;;  %v529_v26 = vpop.f32.mrb[2].mxu1 }
 0x11d   :  { %v225_v27 = vadd.f32 %v521_v25, %v390_v16  ;;  %v257_v28 = vadd.f32 %v529_v26, %v390_v16  ;;  %v216_v29 = vpop.f32.mrb[3].mxu0  ;;  %v248_v30 = vpop.f32.mrb[3].mxu1  ;;  %v278_v33 = vmax.f32 %v222_v19, 0.0  ;;  %v286_v34 = vmax.f32 %v254_v20, 0.0 }
 0x11e   :  { %v217_v31 = vadd.f32 %v390_v16, %v216_v29  ;;  %v249_v32 = vadd.f32 %v390_v16, %v248_v30  ;;  %v276_v37 = vmax.f32 %v214_v23, 0.0  ;;  %v284_v38 = vmax.f32 %v246_v24, 0.0 }
 0x11f   :  { %v279_v35 = vmax.f32 %v225_v27, 0.0  ;;  %v287_v36 = vmax.f32 %v257_v28, 0.0 }
 0x120   :  { %v277_v39 = vmax.f32 %v217_v31, 0.0  ;;  %v285_v40 = vmax.f32 %v249_v32, 0.0 }
 0x121   :  { %v447_v41 = vpack.c.bf16 %v279_v35, %v278_v33  ;;  %v467_v42 = vpack.c.bf16 %v287_v36, %v286_v34 }
 0x122   :  { %v442_v43 = vpack.c.bf16 %v277_v39, %v276_v37  ;;  %v462_v44 = vpack.c.bf16 %v285_v40, %v284_v38  ;;  %v524_v45 = vpop.f32.mrb[4].mxu0  ;;  %v532_v46 = vpop.f32.mrb[4].mxu1 }
 0x123   :  { %479 = vst [vmem:[#allocation7 + $0x8] sm:$0xff] %v447_v41   ;;  %483 = vst [vmem:[#allocation7 + $0x28] sm:$0xff] %v467_v42   ;;  %v238_v47 = vadd.f32 %v524_v45, %v390_v16  ;;  %v270_v48 = vadd.f32 %v532_v46, %v390_v16  ;;  %v229_v49 = vpop.f32.mrb[5].mxu0  ;;  %v261_v50 = vpop.f32.mrb[5].mxu1 }
 0x124   :  { %443 = vst [vmem:[#allocation7] sm:$0xff] %v442_v43   ;;  %482 = vst [vmem:[#allocation7 + $0x20] sm:$0xff] %v462_v44   ;;  %v230_v51 = vadd.f32 %v390_v16, %v229_v49  ;;  %v262_v52 = vadd.f32 %v390_v16, %v261_v50  ;;  %v525_v53 = vpop.f32.mrb[6].mxu0  ;;  %v533_v54 = vpop.f32.mrb[6].mxu1 }
 0x125   :  { %v241_v55 = vadd.f32 %v525_v53, %v390_v16  ;;  %v273_v56 = vadd.f32 %v533_v54, %v390_v16  ;;  %v232_v57 = vpop.f32.mrb[7].mxu0  ;;  %v264_v58 = vpop.f32.mrb[7].mxu1  ;;  %v282_v61 = vmax.f32 %v238_v47, 0.0  ;;  %v290_v62 = vmax.f32 %v270_v48, 0.0 }
 0x126   :  { %v233_v59 = vadd.f32 %v390_v16, %v232_v57  ;;  %v265_v60 = vadd.f32 %v390_v16, %v264_v58  ;;  %v280_v1 = vmax.f32 %v230_v51, 0.0  ;;  %v288_v2 = vmax.f32 %v262_v52, 0.0 }
 0x127   :  { %v283_v63 = vmax.f32 %v241_v55, 0.0  ;;  %v291_v0 = vmax.f32 %v273_v56, 0.0 }
 0x128   :  { %v281_v3 = vmax.f32 %v233_v59, 0.0  ;;  %v289_v4 = vmax.f32 %v265_v60, 0.0 }
 0x129   :  { %v457_v5 = vpack.c.bf16 %v283_v63, %v282_v61  ;;  %v477_v6 = vpack.c.bf16 %v291_v0, %v290_v62 }
 0x12a   :  { %v452_v7 = vpack.c.bf16 %v281_v3, %v280_v1  ;;  %v472_v8 = vpack.c.bf16 %v289_v4, %v288_v2 }
 0x12b   :  { %481 = vst [vmem:[#allocation7 + $0x18] sm:$0xff] %v457_v5   ;;  %485 = vst [vmem:[#allocation7 + $0x38] sm:$0xff] %v477_v6  }
 0x12c   :  { %480 = vst [vmem:[#allocation7 + $0x10] sm:$0xff] %v452_v7   ;;  %484 = vst [vmem:[#allocation7 + $0x30] sm:$0xff] %v472_v8  }
 0x12d   :  { %626 = shalt.err (!%p623_p6)
}
 0x12e   :  { %s627_s15 = scalar_lea.hbm %s719_s3, 1024 }
 0x12f   :  { %p628_p7 = scmp.ne.s32.totalorder %s719_s3, %s627_s15  ;;  %p631_p8 = scmp.lt.u32.totalorder %s627_s15, %s719_s3 }
 0x131   :  { %p633_p9 = pnand %p631_p8, %p628_p7 }
 0x133   :  { %636 = shalt.err (!%p633_p9)
}
 0x134   :  { %383 = dma.vmem_to_hbm [thread:$0]  %s378_s11, 1024, %s719_s3, [#allocation4], %s644_s22, %s644_s22, %s645_s23  }
 0x135   :  { %641 = dma.done.wait [#allocation4], 1024  }
 0x136   :  { %642 = vsyncadd [#allocation4], 4294966272 }
 0x137   :  { %387 = vsyncpa [#allocation3], 1 }
 0x138   :  { %388 = vsyncpa [#allocation6], 1 }
 0x139   :  { %389 = vsyncpa [#allocation4], 1 }

</bundles_post_ra>
